<compile_context>
chip_gen: v6e
topology: v6e:2x2x1
jax: 0.10.0
libtpu: 0.0.40
codegen_flags: <defaults>
</compile_context>

<pallas_src>
import functools

import numpy as np
import jax
import jax.numpy as jnp
from jax.experimental import pallas as pl
from jax.experimental.pallas import tpu as pltpu

_LANE = 128  # TPU lane width; output columns are padded to this for unmasked stores.


def _irreps_dims(irreps):
    # irreps: iterable of (mul, l, parity). Parity is irrelevant for the x(x)x -> 0e path.
    d_in = sum(mul * (2 * l + 1) for (mul, l, _p) in irreps)
    d_out = sum(mul for (mul, l, _p) in irreps)
    return d_in, d_out


@functools.lru_cache(maxsize=32)
def _projection_matrix_np(irreps_key, irrep_normalization, multiplier):
    """(irreps_dim, 128-padded num_irreps) numpy projection encoding the 0e contraction.

    The fixed output multiplier (2.0 in SquareError.forward) is folded into the scales.
    Columns beyond num_irreps are zero (lane padding only).
    """
    irreps = list(irreps_key)
    d_in, d_out = _irreps_dims(irreps)
    d_out_pad = max(_LANE, ((d_out + _LANE - 1) // _LANE) * _LANE)
    w = np.zeros((d_in, d_out_pad), dtype=np.float32)
    row, col = 0, 0
    for (mul, l, _p) in irreps:
        dim = 2 * l + 1
        if irrep_normalization == "component":
            scale = 1.0 / np.sqrt(dim)          # wigner3j(l,l,0) diag, path weight 1
        elif irrep_normalization == "norm":
            scale = np.sqrt(dim)                # extra (2l+1) path weight
        elif irrep_normalization == "none":
            # TODO(synk): confirm e3nn's un-normalized path weight; raw Wigner-3j diag used here.
            scale = 1.0 / np.sqrt(dim)
        else:
            raise ValueError(f"unknown irrep_normalization: {irrep_normalization}")
        scale = scale * multiplier
        for _u in range(mul):
            w[row:row + dim, col] = scale
            row += dim
            col += 1
    return w, d_out, d_out_pad


def _projection_matrix(irreps, irrep_normalization, multiplier=2.0):
    key = tuple((int(m), int(l), int(p)) for (m, l, p) in irreps)
    w_np, d_out, d_out_pad = _projection_matrix_np(key, irrep_normalization, float(multiplier))
    return jnp.asarray(w_np), d_out, d_out_pad


def _square_error_kernel(d_ref, q_ref, w_ref, o_ref):
    # diff + square on the VPU; segmented per-irrep reduction as a tiny sparse matmul on the
    # MXU (idle anyway in this mem-bound kernel).  Normalization and the 2.0 multiplier are
    # already baked into w_ref.
    diff = d_ref[...] - q_ref[...]
    sq = diff * diff
    err = jnp.dot(sq, w_ref[...], preferred_element_type=jnp.float32)
    o_ref[...] = err.astype(o_ref.dtype)


def square_error(descriptor, query_feature, irreps,
                 irrep_normalization="component", block_batch=1024):
    assert descriptor.shape == query_feature.shape
    B, D = descriptor.shape
    d_in, _ = _irreps_dims(irreps)
    assert D == d_in, f"feature dim {D} != irreps dim {d_in}"

    w, d_out, d_out_pad = _projection_matrix(irreps, irrep_normalization, multiplier=2.0)

    # Batch tile: large (default 1024 rows) so each grid step moves enough bytes to hide the
    # fixed per-step pipeline overhead; if the batch is small, one block covers it exactly
    # (block dim == full array dim is always a legal block shape).
    if B <= block_batch:
        bb = B
    else:
        bb = block_batch
        assert bb % 8 == 0, "block_batch must be a multiple of 8 (sublane constraint)"
    grid = (pl.cdiv(B, bb),)

    out = pl.pallas_call(
        _square_error_kernel,
        out_shape=jax.ShapeDtypeStruct((B, d_out_pad), descriptor.dtype),
        grid_spec=pltpu.PrefetchScalarGridSpec(
            num_scalar_prefetch=0,
            grid=grid,
            in_specs=[
                pl.BlockSpec((bb, D), lambda i: (i, 0)),          # descriptor tile
                pl.BlockSpec((bb, D), lambda i: (i, 0)),          # query tile
                pl.BlockSpec((D, d_out_pad), lambda i: (0, 0)),   # projection (VMEM-resident)
            ],
            out_specs=pl.BlockSpec((bb, d_out_pad), lambda i: (i, 0)),  # lane-dense output
        ),
        compiler_params=pltpu.CompilerParams(
            dimension_semantics=("parallel",),
        ),
    )(descriptor, query_feature, w)

    return out[:, :d_out]


def _reference(descriptor, query_feature, irreps, irrep_normalization):
    """Pure numpy reference of SquareError.forward (computed in f32)."""
    diff = np.asarray(descriptor, dtype=np.float32) - np.asarray(query_feature, dtype=np.float32)
    cols = []
    row = 0
    for (mul, l, _p) in irreps:
        dim = 2 * l + 1
        if irrep_normalization in ("component", "none"):
            scale = 1.0 / np.sqrt(dim)
        elif irrep_normalization == "norm":
            scale = np.sqrt(dim)
        else:
            raise ValueError(irrep_normalization)
        for _u in range(mul):
            cols.append((diff[:, row:row + dim] ** 2).sum(-1) * scale)
            row += dim
    return 2.0 * np.stack(cols, axis=-1)


if __name__ == "__main__":
    # Synthetic irreps: 8x0e + 8x1o + 4x2e  ->  dim = 8 + 24 + 20 = 52, 20 scalar outputs.
    irreps = [(8, 0, 1), (8, 1, -1), (4, 2, 1)]
    irrep_normalization = "component"
    D, K = _irreps_dims(irreps)

    key = jax.random.PRNGKey(0)

    # Test 1: small batch, single full-batch block.
    B1 = 16
    k1, k2, key = jax.random.split(key, 3)
    d1 = jax.random.normal(k1, (B1, D), dtype=jnp.float32)
    q1 = jax.random.normal(k2, (B1, D), dtype=jnp.float32)
    out1 = jax.block_until_ready(square_error(d1, q1, irreps, irrep_normalization))
    np.testing.assert_allclose(np.asarray(out1),
                               _reference(d1, q1, irreps, irrep_normalization),
                               rtol=1e-5, atol=1e-5)

    # Test 2: ragged batch with a small explicit tile -> multi-step grid + partial last block.
    B2 = 20
    k3, k4, key = jax.random.split(key, 3)
    d2 = jax.random.normal(k3, (B2, D), dtype=jnp.float32)
    q2 = jax.random.normal(k4, (B2, D), dtype=jnp.float32)
    out2 = jax.block_until_ready(
        square_error(d2, q2, irreps, irrep_normalization, block_batch=8))
    np.testing.assert_allclose(np.asarray(out2),
                               _reference(d2, q2, irreps, irrep_normalization),
                               rtol=1e-5, atol=1e-5)

    # Test 3: ragged batch against the default 1024-row tile (multi-step grid, partial last
    # block, exercises the production tile size) and the 'norm' normalization path.
    B3 = 1500
    k5, k6, key = jax.random.split(key, 3)
    d3 = jax.random.normal(k5, (B3, D), dtype=jnp.float32)
    q3 = jax.random.normal(k6, (B3, D), dtype=jnp.float32)
    out3 = jax.block_until_ready(square_error(d3, q3, irreps, "norm"))
    np.testing.assert_allclose(np.asarray(out3),
                               _reference(d3, q3, irreps, "norm"),
                               rtol=1e-5, atol=1e-5)

    print("KERNEL_OK")
</pallas_src>

<mosaic_0001>
module attributes {stable_mosaic.version = 11 : i64} {
  func.func @_square_error_kernel(%arg0: i32, %arg1: memref<16x52xf32, #tpu.memory_space<vmem>>, %arg2: memref<16x52xf32, #tpu.memory_space<vmem>>, %arg3: memref<52x128xf32, #tpu.memory_space<vmem>>, %arg4: memref<16x128xf32, #tpu.memory_space<vmem>>) attributes {dimension_semantics = [#tpu.dimension_semantics<parallel>], iteration_bounds = array<i64: 1>, scalar_prefetch = 0 : i64, scratch_operands = 0 : i64, tpu.core_type = #tpu.core_type<tc>, window_params = [{transform_indices = @transform_0, window_bounds = array<i64: 16, 52>}, {transform_indices = @transform_1, window_bounds = array<i64: 16, 52>}, {pipeline_mode = #tpu.pipeline_mode<synchronous>, transform_indices = @transform_2, window_bounds = array<i64: 52, 128>}, {transform_indices = @transform_3, window_bounds = array<i64: 16, 128>}]} {
    %c0 = arith.constant 0 : index
    %c0_0 = arith.constant 0 : index
    %0 = vector.load %arg1[%c0, %c0_0] : memref<16x52xf32, #tpu.memory_space<vmem>>, vector<16x52xf32>
    %c0_1 = arith.constant 0 : index
    %c0_2 = arith.constant 0 : index
    %1 = vector.load %arg2[%c0_1, %c0_2] : memref<16x52xf32, #tpu.memory_space<vmem>>, vector<16x52xf32>
    %2 = arith.subf %0, %1 : vector<16x52xf32>
    %3 = arith.mulf %2, %2 : vector<16x52xf32>
    %c0_3 = arith.constant 0 : index
    %c0_4 = arith.constant 0 : index
    %4 = vector.load %arg3[%c0_3, %c0_4] : memref<52x128xf32, #tpu.memory_space<vmem>>, vector<52x128xf32>
    %cst = arith.constant dense<0.000000e+00> : vector<16x128xf32>
    %5 = tpu.matmul %3, %4, %cst {dimension_numbers = #tpu.dot_dimension_numbers<[1], [0], [0], [1], [0, 0, 1, 1], [], []>} : vector<16x52xf32>, vector<52x128xf32>, vector<16x128xf32> -> vector<16x128xf32>
    %c0_5 = arith.constant 0 : index
    %c0_6 = arith.constant 0 : index
    %6 = vector.load %arg4[%c0_5, %c0_6] : memref<16x128xf32, #tpu.memory_space<vmem>>, vector<16x128xf32>
    tpu.vector_store %arg4[%c0_5, %c0_6], %5 {strides = array<i32>} : memref<16x128xf32, #tpu.memory_space<vmem>>, vector<16x128xf32>,
    return
  }
  func.func @transform_0(%arg0: i32) -> (i32, i32) {
    %c0_i32 = arith.constant 0 : i32
    %c0_i32_0 = arith.constant 0 : i32
    return %arg0, %c0_i32 : i32, i32
  }
  func.func @transform_1(%arg0: i32) -> (i32, i32) {
    %c0_i32 = arith.constant 0 : i32
    %c0_i32_0 = arith.constant 0 : i32
    return %arg0, %c0_i32 : i32, i32
  }
  func.func @transform_2(%arg0: i32) -> (i32, i32) {
    %c0_i32 = arith.constant 0 : i32
    %c0_i32_0 = arith.constant 0 : i32
    %c0_i32_1 = arith.constant 0 : i32
    return %c0_i32, %c0_i32_0 : i32, i32
  }
  func.func @transform_3(%arg0: i32) -> (i32, i32) {
    %c0_i32 = arith.constant 0 : i32
    %c0_i32_0 = arith.constant 0 : i32
    return %arg0, %c0_i32 : i32, i32
  }
}

</mosaic_0001>

<bundles_post_ra>
// kernel: tpu_custom_call.1
= control target key start
LH: loop header
LB: loop body
LE: loop exit
PB: predicated region body
PF: predicated region fallthrough
CT: control target
= control target key end

     0   :  { %8 = vsyncpa [#allocation3], 0  ;;  %s350_s0 = inlined_call_operand.hbm [shape: f32[16,52], index: 0, kind: input, shape index: {}]   ;;  %s351_s1 = inlined_call_operand.hbm [shape: f32[16,52], index: 1, kind: input, shape index: {}]   ;;  %s352_s2 = inlined_call_operand.hbm [shape: f32[52,128], index: 2, kind: input, shape index: {}]   ;;  %s353_s3 = inlined_call_operand.hbm [shape: f32[16,128], index: 3, kind: output, shape index: {}]  }
   0x1   :  { %9 = vsyncpa [#allocation6], 0 }
   0x2   :  { %10 = vsyncpa [#allocation4], 0  ;;  %s298_s12 = smov [#allocation5]   ;;  %s299_s14 = smov [#allocation2]  }
   0x3   :  { %s28_s13 = sshll.u32 %s298_s12, 4  ;;  %s16_s15 = sshll.u32 %s299_s14, 4  ;;  %s29_s13 = int_to_ptr.vmem [resolvable:$true] %s28_s13  ;;  %s17_s15 = int_to_ptr.vmem [resolvable:$true] %s16_s15 }
   0x4   :  { %s220_s16 = scalar_lea.vmem %s29_s13, 256  ;;  %p225_p1 = scmp.lt.s32.totalorder %s29_s13, %s29_s13 }
   0x5   :  { %p221_p0 = scmp.ne.s32.totalorder %s29_s13, %s220_s16  ;;  %p226_p2 = scmp.lt.s32.totalorder %s220_s16, %s220_s16 }
   0x7   :  { %p227_p3 = por %p226_p2, %p225_p1 }
   0x9   :  { %p228_p4 = pnand %p227_p3, %p221_p0 }
   0xb   :  { %231 = shalt.err (!%p228_p4)
}
   0xc   :  { %s300_s17 = smov 128   ;;  %s301_s18 = smov 8  }
   0xd   :  { %34 = dma.hbm_to_vmem [thread:$0]  %s351_s1, 256, %s29_s13, [#allocation6], %s300_s17, %s300_s17, %s301_s18  }
   0xe   :  { %s240_s21 = scalar_lea.vmem %s17_s15, 256  ;;  %p245_p6 = scmp.lt.s32.totalorder %s17_s15, %s17_s15 }
   0xf   :  { %p241_p5 = scmp.ne.s32.totalorder %s17_s15, %s240_s21  ;;  %p246_p7 = scmp.lt.s32.totalorder %s240_s21, %s240_s21 }
  0x11   :  { %p247_p8 = por %p246_p7, %p245_p6 }
  0x13   :  { %p248_p9 = pnand %p247_p8, %p241_p5 }
  0x15   :  { %251 = shalt.err (!%p248_p9)
}
  0x16   :  { %22 = dma.hbm_to_vmem [thread:$0]  %s350_s0, 256, %s17_s15, [#allocation3], %s300_s17, %s300_s17, %s301_s18  }
  0x17   :  { %s302_s24 = smov [#allocation7]  }
  0x18   :  { %s40_s25 = sshll.u32 %s302_s24, 4  ;;  %s41_s25 = int_to_ptr.vmem [resolvable:$true] %s40_s25 }
  0x19   :  { %s260_s26 = scalar_lea.vmem %s41_s25, 896  ;;  %p265_p11 = scmp.lt.s32.totalorder %s41_s25, %s41_s25 }
  0x1a   :  { %p261_p10 = scmp.ne.s32.totalorder %s41_s25, %s260_s26  ;;  %p266_p12 = scmp.lt.s32.totalorder %s260_s26, %s260_s26 }
  0x1c   :  { %p267_p13 = por %p266_p12, %p265_p11 }
  0x1e   :  { %p268_p0 = pnand %p267_p13, %p261_p10 }
  0x20   :  { %271 = shalt.err (!%p268_p0)
}
  0x21   :  { %46 = dma.hbm_to_vmem [thread:$0]  %s352_s2, 896, %s41_s25, [#allocation6], %s300_s17, %s300_s17, %s301_s18  }
  0x22   :  { %292 = dma.done.wait [#allocation3], 256  }
  0x23   :  { %293 = vsyncadd [#allocation3], 4294967040 }
  0x24   :  { %294 = dma.done.wait [#allocation6], 1152  }
  0x25   :  { %295 = vsyncadd [#allocation6], 4294966144  ;;  %vm78_vm0 = vcmask 1043456   ;;  %v70_v0 = vld [vmem:[#allocation7 + $0x30] sm:$0xf]  ;;  %v69_v1 = vld [vmem:[#allocation7 + $0x28] sm:$0xff] }
  0x26   :  { %189 = vmatprep.subr.msk.mxu0 %vm78_vm0, %v70_v0  ;;  %v68_v2 = vld [vmem:[#allocation7 + $0x20] sm:$0xff]  ;;  %v58_v4 = vld [vmem:[#allocation5] sm:$0xff]  ;;  %v67_v6 = vld [vmem:[#allocation7 + $0x18] sm:$0xff]  ;;  %vm71_vm1 = vcmask 424960   ;;  %s303_s0 = smov [#allocation8]  }
  0x27   :  { %190 = vmatpush3.msk.msra.mxu0 %vm78_vm0, %v70_v0  ;;  %v56_v3 = vld [vmem:[#allocation2] sm:$0xff]  ;;  %v57_v7 = vld [vmem:[#allocation2 + $0x8] sm:$0xff]  ;;  %v59_v8 = vld [vmem:[#allocation5 + $0x8] sm:$0xff]  ;;  %s164_s2 = sshll.u32 %s303_s0, 4  ;;  %s165_s2 = int_to_ptr.vmem [resolvable:$true] %s164_s2 }
  0x28   :  { %191 = vmatprep.subr.mxu0 %v69_v1  ;;  %v60_v5 = vsub.f32 %v56_v3, %v58_v4  ;;  %v66_v10 = vld [vmem:[#allocation7 + $0x10] sm:$0xff]  ;;  %v61_v11 = vsub.f32 %v57_v7, %v59_v8  ;;  %v65_v12 = vld [vmem:[#allocation7 + $0x8] sm:$0xff]  ;;  %v64_v13 = vld [vmem:[#allocation7] sm:$0xff]  ;;  %s272_s28 = scalar_lea.vmem %s165_s2, 256  ;;  %p277_p2 = scmp.lt.s32.totalorder %s165_s2, %s165_s2 }
  0x29   :  { %192 = vmatpush3.msra.mxu0 %v69_v1  ;;  %p273_p1 = scmp.ne.s32.totalorder %s165_s2, %s272_s28  ;;  %p278_p3 = scmp.lt.s32.totalorder %s272_s28, %s272_s28 }
  0x2a   :  { %193 = vmatprep.subr.mxu0 %v68_v2  ;;  %v62_v9 = vmul.f32 %v60_v5, %v60_v5  ;;  %v63_v14 = vmul.f32 %v61_v11, %v61_v11 }
  0x2b   :  { %194 = vmatpush3.msra.mxu0 %v68_v2  ;;  %p279_p4 = por %p278_p3, %p277_p2 }
  0x2c   :  { %195 = vmatprep.subr.mxu0 %v67_v6  ;;  %203 = vmatprep.mubr.msk.f32.mxu0 %vm71_vm1, %v62_v9 }
  0x2d   :  { %196 = vmatpush3.msra.mxu0 %v67_v6  ;;  %p280_p5 = pnand %p279_p4, %p273_p1 }
  0x2e   :  { %197 = vmatprep.subr.mxu0 %v66_v10 }
  0x2f   :  { %198 = vmatpush3.msra.mxu0 %v66_v10 }
  0x30   :  { %199 = vmatprep.subr.mxu0 %v65_v12 }
  0x31   :  { %200 = vmatpush3.msra.mxu0 %v65_v12 }
  0x32   :  { %201 = vmatprep.subr.mxu0 %v64_v13 }
  0x33   :  { %202 = vmatpush3.msra.mxu0 %v64_v13 }
  0x34   :  { %204 = vmatmul.mubr.msk.f32.vlgmr.msra.gmra.mxu0 %vm71_vm1, %v63_v14 }
  0xf4   :  { %v205_v15 = vpop.f32.mrf.mxu0 }
  0xf5   :  { %158 = vst [vmem:[#allocation8 + $0x8] sm:$0xff] %v205_v15 }
  0xf6   :  { %v148_v16 = vpop.f32.mrf.mxu0 }
  0xf7   :  { %157 = vst [vmem:[#allocation8] sm:$0xff] %v148_v16 }
  0xf8   :  { %283 = shalt.err (!%p280_p5)
}
  0xf9   :  { %170 = dma.vmem_to_hbm [thread:$0]  %s165_s2, 256, %s353_s3, [#allocation4], %s300_s17, %s300_s17, %s301_s18  }
  0xfa   :  { %296 = dma.done.wait [#allocation4], 256  }
  0xfb   :  { %297 = vsyncadd [#allocation4], 4294967040 }
  0xfc   :  { %174 = vsyncpa [#allocation3], 1 }
  0xfd   :  { %175 = vsyncpa [#allocation6], 1 }
  0xfe   :  { %176 = vsyncpa [#allocation4], 1 }

</bundles_post_ra>
